<compile_context>
chip_gen: v7x
topology: tpu7x:2x2x1
jax: 0.10.0
libtpu: 0.0.40
codegen_flags: <defaults>
</compile_context>

<pallas_src>
import functools

import jax
import jax.numpy as jnp
from jax import lax
from jax.experimental import pallas as pl
from jax.experimental.pallas import tpu as pltpu


def _fold128(x):
    """Sum 128-lane slabs: (rows, W) -> (rows, 128). Requires W % 128 == 0."""
    w = x.shape[-1]
    r = x[:, 0:128]
    for off in range(128, w, 128):
        r = r + x[:, off:off + 128]
    return r


def _dice_ce_kernel(logits_ref, tgt_ref,
                    inter_ref, zsum_ref, cnt_ref, ce_ref,
                    *, hw, chunk, apply_softmax, needs_mask, acc_in_refs,
                    unroll):
    C, TN = logits_ref.shape
    n_chunks = TN // chunk
    tile_i = pl.program_id(1)

    # Loop-invariant vreg constructions (JAX does not CSE iota/broadcast).
    cls_iota = lax.broadcasted_iota(jnp.int32, (C, chunk), 0)
    lane_iota = lax.broadcasted_iota(jnp.int32, (1, chunk), 1)

    def chunk_stats(j, masked):
        """Partial (C,128)/(1,128) statistics for lane chunk j."""
        off = pl.multiple_of(j * chunk, 128)
        logits = logits_ref[:, pl.ds(off, chunk)].astype(jnp.float32)  # (C, w)
        tgt = tgt_ref[:, pl.ds(off, chunk)]                            # (1, w)
        sel_b = cls_iota == tgt                                        # (C, w)
        if masked:
            # Columns past the real pixel count (ragged tail / block padding)
            # may hold undefined data: mask logits BEFORE exp so NaN/Inf
            # cannot leak, and zero their contributions below.
            valid = (tile_i * TN + off + lane_iota) < hw               # (1, w)
            validf = valid.astype(jnp.float32)
            valid_c = jnp.broadcast_to(valid, (C, chunk))              # (C, w)
            logits = jnp.where(valid_c, logits, 0.0)
            sel_b = sel_b & valid_c
        sel = sel_b.astype(jnp.float32)

        # Numerically-stable softmax over the class (sublane) axis.
        m = jnp.max(logits, axis=0, keepdims=True)                     # (1, w)
        e = jnp.exp(logits - m)
        s = jnp.sum(e, axis=0, keepdims=True)                          # (1, w)
        probs = e * pl.reciprocal(s, approx=True)                      # EUP slot
        score = probs if apply_softmax else logits

        # Cross-entropy per pixel: logsumexp(logits) - logit[target].
        lse = m + jnp.log(s)                                           # (1, w)
        if masked:
            lse = lse * validf
        ce_terms = lse - jnp.sum(logits * sel, axis=0, keepdims=True)

        sq = score * score
        if masked:
            sq = jnp.where(valid_c, sq, 0.0)

        # Lane-wise folds to 128-wide partials (VPU-only adds).
        return (_fold128(score * sel), _fold128(sq),
                _fold128(sel), _fold128(ce_terms))

    def run(masked):
        if acc_in_refs:
            # Large C: accumulate into the VMEM-resident output blocks so the
            # vreg working set stays bounded (no 3*C/8-vreg carry).
            inter_ref[...] = jnp.zeros_like(inter_ref)
            zsum_ref[...] = jnp.zeros_like(zsum_ref)
            cnt_ref[...] = jnp.zeros_like(cnt_ref)
            ce_ref[...] = jnp.zeros_like(ce_ref)

            def body(j, carry):
                d_inter, d_zsum, d_cnt, d_ce = chunk_stats(j, masked)
                inter_ref[...] += d_inter
                zsum_ref[...] += d_zsum
                cnt_ref[...] += d_cnt
                ce_ref[...] += d_ce
                return carry

            lax.fori_loop(0, n_chunks, body, 0, unroll=unroll)
        else:
            def body(j, carry):
                a_inter, a_zsum, a_cnt, a_ce = carry
                d_inter, d_zsum, d_cnt, d_ce = chunk_stats(j, masked)
                return (a_inter + d_inter, a_zsum + d_zsum,
                        a_cnt + d_cnt, a_ce + d_ce)

            init = (jnp.zeros((C, 128), jnp.float32),
                    jnp.zeros((C, 128), jnp.float32),
                    jnp.zeros((C, 128), jnp.float32),
                    jnp.zeros((1, 128), jnp.float32))
            a_inter, a_zsum, a_cnt, a_ce = lax.fori_loop(
                0, n_chunks, body, init, unroll=unroll)
            inter_ref[...] = a_inter
            zsum_ref[...] = a_zsum
            cnt_ref[...] = a_cnt
            ce_ref[...] = a_ce

    if not needs_mask:
        run(masked=False)
    else:
        full = (tile_i + 1) * TN <= hw        # mask-free fast path for interior tiles

        @pl.when(full)
        def _():
            run(masked=False)

        @pl.when(jnp.logical_not(full))
        def _():
            run(masked=True)


def dice_ce_loss(logits_nchw, target, n_classes, weight=None, softmax=True,
                 tile_cols=131072):
    """0.5 * (DiceLoss(softmax(logits), onehot(target)) + CE(logits, target))."""
    B, C, H, W = logits_nchw.shape
    assert C == n_classes
    HW = H * W
    N = B * HW

    # Native layout: [B, C, H, W] -> [B, C, HW] and [B, H, W] -> [B, 1, HW].
    # Both reshapes are free (no transpose, no data movement).
    logits = logits_nchw.reshape(B, C, HW)
    tgt = target.reshape(B, 1, HW).astype(jnp.int32)

    # Lane-chunk width processed per inner fori_loop step.
    if n_classes <= 8:
        chunk = 512
    elif n_classes <= 32:
        chunk = 256
    else:
        chunk = 128
    hw128 = pl.cdiv(HW, 128) * 128
    chunk = min(chunk, hw128, max(128, (tile_cols // 128) * 128))

    # Pad the pixel axis to a multiple of `chunk` (no-op for the usual
    # segmentation shapes); keeps every block a whole number of chunks and
    # TN <= padded extent.
    hw_pad = pl.cdiv(HW, chunk) * chunk
    if hw_pad != HW:
        logits = jnp.pad(logits, ((0, 0), (0, 0), (0, hw_pad - HW)))
        tgt = jnp.pad(tgt, ((0, 0), (0, 0), (0, hw_pad - HW)),
                      constant_values=-1)

    # Pixel-tile width: a few MiB for the double-buffered input blocks,
    # derived from the actual chip's VMEM so the choice ports to v7x (64 MiB).
    try:
        vmem_cap = pltpu.get_tpu_info().vmem_capacity_bytes
    except Exception:  # conservative (v7x-sized) fallback
        vmem_cap = 64 * 1024 * 1024
    budget = min(vmem_cap // 8, 8 * 1024 * 1024)
    itemsize = jnp.dtype(logits.dtype).itemsize
    col_bytes = C * itemsize + 4          # logits column + int32 target column
    tn_cap = min(tile_cols, max(chunk, budget // (2 * col_bytes)))
    tn_cap = max(chunk, (tn_cap // chunk) * chunk)
    TN = min(tn_cap, hw_pad)
    num_tiles = pl.cdiv(hw_pad, TN)
    TN = pl.cdiv(pl.cdiv(hw_pad, num_tiles), chunk) * chunk   # balance tiles
    num_tiles = pl.cdiv(hw_pad, TN)

    n_chunks = TN // chunk
    unroll = min(4 if n_classes <= 8 else 2, n_chunks)
    needs_mask = (num_tiles * TN) != HW
    acc_in_refs = n_classes > 32

    kernel = functools.partial(
        _dice_ce_kernel, hw=HW, chunk=chunk, apply_softmax=softmax,
        needs_mask=needs_mask, acc_in_refs=acc_in_refs, unroll=unroll)

    # Per-(batch, tile) partial outputs: every grid step owns its own block,
    # so both grid axes are "parallel" (v7x: both TCs used even when B == 1).
    stat_shape = jax.ShapeDtypeStruct((B, num_tiles, C, 128), jnp.float32)
    ce_shape = jax.ShapeDtypeStruct((B, num_tiles, 1, 128), jnp.float32)
    stat_spec = pl.BlockSpec((None, None, C, 128), lambda b, i: (b, i, 0, 0))
    ce_spec = pl.BlockSpec((None, None, 1, 128), lambda b, i: (b, i, 0, 0))

    inter, zsum, cnt, ce = pl.pallas_call(
        kernel,
        out_shape=(stat_shape, stat_shape, stat_shape, ce_shape),
        grid_spec=pltpu.PrefetchScalarGridSpec(
            num_scalar_prefetch=0,
            grid=(B, num_tiles),
            in_specs=[
                pl.BlockSpec((None, C, TN), lambda b, i: (b, 0, i)),
                pl.BlockSpec((None, 1, TN), lambda b, i: (b, 0, i)),
            ],
            out_specs=[stat_spec, stat_spec, stat_spec, ce_spec],
        ),
        compiler_params=pltpu.CompilerParams(
            dimension_semantics=("parallel", "parallel"),
            vmem_limit_bytes=32 * 1024 * 1024),
    )(logits, tgt)

    if weight is None:
        weight = jnp.ones((n_classes,), jnp.float32)
    else:
        weight = jnp.asarray(weight, jnp.float32)

    smooth = 1e-5
    inter_c = jnp.sum(inter, axis=(0, 1, 3))
    zsum_c = jnp.sum(zsum, axis=(0, 1, 3))
    cnt_c = jnp.sum(cnt, axis=(0, 1, 3))
    dice_per_class = 1.0 - (2.0 * inter_c + smooth) / (zsum_c + cnt_c + smooth)
    # As in the PyTorch module, `weight` only scales the Dice term; CE uses the
    # default (unweighted) nn.CrossEntropyLoss mean over B*H*W pixels.
    dice_loss = jnp.sum(dice_per_class * weight) / n_classes
    ce_loss = jnp.sum(ce) / N

    return 0.5 * (dice_loss + ce_loss)


def _reference(logits, target, n_classes):
    # Pure-JAX reference mirroring the PyTorch module (for sanity checking).
    probs = jax.nn.softmax(logits, axis=1)
    onehot = (target[:, None, :, :] == jnp.arange(n_classes)[None, :, None, None]
              ).astype(jnp.float32)
    smooth = 1e-5
    loss = 0.0
    for i in range(n_classes):
        s, t = probs[:, i], onehot[:, i]
        intersect = jnp.sum(s * t)
        y_sum = jnp.sum(t * t)
        z_sum = jnp.sum(s * s)
        dice = 1.0 - (2 * intersect + smooth) / (z_sum + y_sum + smooth)
        loss = loss + dice
    dice_loss = loss / n_classes
    logp = jax.nn.log_softmax(logits, axis=1)
    ce = -jnp.mean(jnp.take_along_axis(logp, target[:, None], axis=1))
    return 0.5 * (dice_loss + ce)


if __name__ == "__main__":
    key = jax.random.PRNGKey(0)
    # Tolerances account for the EUP approx-reciprocal softmax denominator
    # (~2^-12 relative) plus lane-folded accumulation order.
    RTOL = ATOL = 2e-3

    # Case 1: H*W already a multiple of the chunk width, single tile,
    # mask-free fast path only.
    B, C, H, W = 2, 4, 16, 16
    k1, k2, k3, k4 = jax.random.split(key, 4)
    logits = jax.random.normal(k1, (B, C, H, W), dtype=jnp.float32)
    target = jax.random.randint(k2, (B, H, W), 0, C, dtype=jnp.int32)
    loss = jax.block_until_ready(dice_ce_loss(logits, target, n_classes=C))
    ref = _reference(logits, target, C)
    assert jnp.allclose(loss, ref, rtol=RTOL, atol=ATOL), (loss, ref)

    # Case 2: ragged pixel count + multiple pixel tiles (exercises the
    # fast/masked pl.when branches and the per-tile partial outputs).
    H2, W2 = 16, 20  # H*W = 320, not a multiple of 128
    logits2 = jax.random.normal(k3, (B, C, H2, W2), dtype=jnp.float32)
    target2 = jax.random.randint(k4, (B, H2, W2), 0, C, dtype=jnp.int32)
    loss2 = jax.block_until_ready(
        dice_ce_loss(logits2, target2, n_classes=C, tile_cols=256))
    ref2 = _reference(logits2, target2, C)
    assert jnp.allclose(loss2, ref2, rtol=RTOL, atol=ATOL), (loss2, ref2)

    # Case 3: bf16 logits accepted at the kernel boundary (halves HBM traffic);
    # math stays in f32 inside the kernel.
    logits_bf16 = logits.astype(jnp.bfloat16)
    loss3 = jax.block_until_ready(dice_ce_loss(logits_bf16, target, n_classes=C))
    ref3 = _reference(logits_bf16.astype(jnp.float32), target, C)
    assert jnp.allclose(loss3, ref3, rtol=RTOL, atol=ATOL), (loss3, ref3)

    print("KERNEL_OK")
</pallas_src>

<mosaic_0001>
module attributes {stable_mosaic.version = 11 : i64} {
  func.func @_dice_ce_kernel(%arg0: i32, %arg1: i32, %arg2: memref<1x4x256xf32, #tpu.memory_space<vmem>>, %arg3: memref<1x1x256xi32, #tpu.memory_space<vmem>>, %arg4: memref<1x1x4x128xf32, #tpu.memory_space<vmem>>, %arg5: memref<1x1x4x128xf32, #tpu.memory_space<vmem>>, %arg6: memref<1x1x4x128xf32, #tpu.memory_space<vmem>>, %arg7: memref<1x1x1x128xf32, #tpu.memory_space<vmem>>) attributes {dimension_semantics = [#tpu.dimension_semantics<parallel>, #tpu.dimension_semantics<parallel>], iteration_bounds = array<i64: 2, 1>, scalar_prefetch = 0 : i64, scratch_operands = 0 : i64, tpu.core_type = #tpu.core_type<tc>, window_params = [{transform_indices = @transform_0, window_bounds = array<i64: 1, 4, 256>}, {transform_indices = @transform_1, window_bounds = array<i64: 1, 1, 256>}, {transform_indices = @transform_2, window_bounds = array<i64: 1, 1, 4, 128>}, {transform_indices = @transform_3, window_bounds = array<i64: 1, 1, 4, 128>}, {transform_indices = @transform_4, window_bounds = array<i64: 1, 1, 4, 128>}, {transform_indices = @transform_5, window_bounds = array<i64: 1, 1, 1, 128>}]} {
    %0 = tpu.iota {dimensions = array<i32: 0>} : vector<4x256xi32>
    %cst = arith.constant 0.000000e+00 : f32
    %1 = vector.broadcast %cst : f32 to vector<4x128xf32>
    %cst_0 = arith.constant 0.000000e+00 : f32
    %2 = vector.broadcast %cst_0 : f32 to vector<4x128xf32>
    %cst_1 = arith.constant 0.000000e+00 : f32
    %3 = vector.broadcast %cst_1 : f32 to vector<4x128xf32>
    %cst_2 = arith.constant 0.000000e+00 : f32
    %4 = vector.broadcast %cst_2 : f32 to vector<1x128xf32>
    %c0_i32 = arith.constant 0 : i32
    %c256_i32 = arith.constant 256 : i32
    %5 = arith.muli %c0_i32, %c256_i32 : i32
    %6 = tpu.assume_multiple %5, 128 : i32
    %c0 = arith.constant 0 : index
    %c0_3 = arith.constant 0 : index
    %7 = arith.index_cast %6 : i32 to index
    %8 = vector.load %arg2[%c0, %c0_3, %7] : memref<1x4x256xf32, #tpu.memory_space<vmem>>, vector<1x4x256xf32>
    %9 = vector.shape_cast %8 : vector<1x4x256xf32> to vector<4x256xf32>
    %c0_4 = arith.constant 0 : index
    %c0_5 = arith.constant 0 : index
    %10 = arith.index_cast %6 : i32 to index
    %11 = vector.load %arg3[%c0_4, %c0_5, %10] : memref<1x1x256xi32, #tpu.memory_space<vmem>>, vector<1x1x256xi32>
    %12 = vector.shape_cast %11 : vector<1x1x256xi32> to vector<1x256xi32>
    %13 = vector.broadcast %12 : vector<1x256xi32> to vector<4x256xi32>
    %14 = arith.cmpi eq, %0, %13 : vector<4x256xi32>
    %15 = arith.extui %14 : vector<4x256xi1> to vector<4x256xi32>
    %16 = arith.sitofp %15 : vector<4x256xi32> to vector<4x256xf32>
    %cst_6 = arith.constant dense<0xFF800000> : vector<256xf32>
    %17 = vector.multi_reduction <maximumf>, %9, %cst_6 [0] : vector<4x256xf32> to vector<256xf32>
    %18 = vector.shape_cast %17 : vector<256xf32> to vector<1x256xf32>
    %19 = vector.broadcast %18 : vector<1x256xf32> to vector<4x256xf32>
    %20 = arith.subf %9, %19 : vector<4x256xf32>
    %21 = math.exp %20 : vector<4x256xf32>
    %cst_7 = arith.constant dense<0.000000e+00> : vector<256xf32>
    %22 = vector.multi_reduction <add>, %21, %cst_7 [0] : vector<4x256xf32> to vector<256xf32>
    %23 = vector.shape_cast %22 : vector<256xf32> to vector<1x256xf32>
    %24 = tpu.reciprocal %23 {approx = true} : vector<1x256xf32> -> vector<1x256xf32>
    %25 = vector.broadcast %24 : vector<1x256xf32> to vector<4x256xf32>
    %26 = arith.mulf %21, %25 : vector<4x256xf32>
    %27 = math.log %23 : vector<1x256xf32>
    %28 = arith.addf %18, %27 : vector<1x256xf32>
    %29 = arith.mulf %9, %16 : vector<4x256xf32>
    %cst_8 = arith.constant dense<0.000000e+00> : vector<256xf32>
    %30 = vector.multi_reduction <add>, %29, %cst_8 [0] : vector<4x256xf32> to vector<256xf32>
    %31 = vector.shape_cast %30 : vector<256xf32> to vector<1x256xf32>
    %32 = arith.subf %28, %31 : vector<1x256xf32>
    %33 = arith.mulf %26, %26 : vector<4x256xf32>
    %34 = arith.mulf %26, %16 : vector<4x256xf32>
    %35 = vector.extract_strided_slice %34 {offsets = [0, 0], sizes = [4, 128], strides = [1, 1]} : vector<4x256xf32> to vector<4x128xf32>
    %36 = vector.extract_strided_slice %34 {offsets = [0, 128], sizes = [4, 128], strides = [1, 1]} : vector<4x256xf32> to vector<4x128xf32>
    %37 = arith.addf %35, %36 : vector<4x128xf32>
    %38 = vector.extract_strided_slice %33 {offsets = [0, 0], sizes = [4, 128], strides = [1, 1]} : vector<4x256xf32> to vector<4x128xf32>
    %39 = vector.extract_strided_slice %33 {offsets = [0, 128], sizes = [4, 128], strides = [1, 1]} : vector<4x256xf32> to vector<4x128xf32>
    %40 = arith.addf %38, %39 : vector<4x128xf32>
    %41 = vector.extract_strided_slice %16 {offsets = [0, 0], sizes = [4, 128], strides = [1, 1]} : vector<4x256xf32> to vector<4x128xf32>
    %42 = vector.extract_strided_slice %16 {offsets = [0, 128], sizes = [4, 128], strides = [1, 1]} : vector<4x256xf32> to vector<4x128xf32>
    %43 = arith.addf %41, %42 : vector<4x128xf32>
    %44 = vector.extract_strided_slice %32 {offsets = [0, 0], sizes = [1, 128], strides = [1, 1]} : vector<1x256xf32> to vector<1x128xf32>
    %45 = vector.extract_strided_slice %32 {offsets = [0, 128], sizes = [1, 128], strides = [1, 1]} : vector<1x256xf32> to vector<1x128xf32>
    %46 = arith.addf %44, %45 : vector<1x128xf32>
    %47 = arith.addf %1, %37 : vector<4x128xf32>
    %48 = arith.addf %2, %40 : vector<4x128xf32>
    %49 = arith.addf %3, %43 : vector<4x128xf32>
    %50 = arith.addf %4, %46 : vector<1x128xf32>
    %c1_i32 = arith.constant 1 : i32
    %c0_9 = arith.constant 0 : index
    %c0_10 = arith.constant 0 : index
    %c0_11 = arith.constant 0 : index
    %c0_12 = arith.constant 0 : index
    %51 = vector.load %arg4[%c0_9, %c0_10, %c0_11, %c0_12] : memref<1x1x4x128xf32, #tpu.memory_space<vmem>>, vector<1x1x4x128xf32>
    %52 = vector.shape_cast %51 : vector<1x1x4x128xf32> to vector<4x128xf32>
    %53 = vector.shape_cast %47 : vector<4x128xf32> to vector<1x1x4x128xf32>
    tpu.vector_store %arg4[%c0_9, %c0_10, %c0_11, %c0_12], %53 {strides = array<i32>} : memref<1x1x4x128xf32, #tpu.memory_space<vmem>>, vector<1x1x4x128xf32>,
    %c0_13 = arith.constant 0 : index
    %c0_14 = arith.constant 0 : index
    %c0_15 = arith.constant 0 : index
    %c0_16 = arith.constant 0 : index
    %54 = vector.load %arg5[%c0_13, %c0_14, %c0_15, %c0_16] : memref<1x1x4x128xf32, #tpu.memory_space<vmem>>, vector<1x1x4x128xf32>
    %55 = vector.shape_cast %54 : vector<1x1x4x128xf32> to vector<4x128xf32>
    %56 = vector.shape_cast %48 : vector<4x128xf32> to vector<1x1x4x128xf32>
    tpu.vector_store %arg5[%c0_13, %c0_14, %c0_15, %c0_16], %56 {strides = array<i32>} : memref<1x1x4x128xf32, #tpu.memory_space<vmem>>, vector<1x1x4x128xf32>,
    %c0_17 = arith.constant 0 : index
    %c0_18 = arith.constant 0 : index
    %c0_19 = arith.constant 0 : index
    %c0_20 = arith.constant 0 : index
    %57 = vector.load %arg6[%c0_17, %c0_18, %c0_19, %c0_20] : memref<1x1x4x128xf32, #tpu.memory_space<vmem>>, vector<1x1x4x128xf32>
    %58 = vector.shape_cast %57 : vector<1x1x4x128xf32> to vector<4x128xf32>
    %59 = vector.shape_cast %49 : vector<4x128xf32> to vector<1x1x4x128xf32>
    tpu.vector_store %arg6[%c0_17, %c0_18, %c0_19, %c0_20], %59 {strides = array<i32>} : memref<1x1x4x128xf32, #tpu.memory_space<vmem>>, vector<1x1x4x128xf32>,
    %c0_21 = arith.constant 0 : index
    %c0_22 = arith.constant 0 : index
    %c0_23 = arith.constant 0 : index
    %c0_24 = arith.constant 0 : index
    %60 = vector.load %arg7[%c0_21, %c0_22, %c0_23, %c0_24] : memref<1x1x1x128xf32, #tpu.memory_space<vmem>>, vector<1x1x1x128xf32>
    %61 = vector.shape_cast %60 : vector<1x1x1x128xf32> to vector<1x128xf32>
    %62 = vector.shape_cast %50 : vector<1x128xf32> to vector<1x1x1x128xf32>
    tpu.vector_store %arg7[%c0_21, %c0_22, %c0_23, %c0_24], %62 {strides = array<i32>} : memref<1x1x1x128xf32, #tpu.memory_space<vmem>>, vector<1x1x1x128xf32>,
    return
  }
  func.func @transform_0(%arg0: i32, %arg1: i32) -> (i32, i32, i32) {
    %c0_i32 = arith.constant 0 : i32
    %c0_i32_0 = arith.constant 0 : i32
    return %arg0, %c0_i32, %arg1 : i32, i32, i32
  }
  func.func @transform_1(%arg0: i32, %arg1: i32) -> (i32, i32, i32) {
    %c0_i32 = arith.constant 0 : i32
    %c0_i32_0 = arith.constant 0 : i32
    return %arg0, %c0_i32, %arg1 : i32, i32, i32
  }
  func.func @transform_2(%arg0: i32, %arg1: i32) -> (i32, i32, i32, i32) {
    %c0_i32 = arith.constant 0 : i32
    %c0_i32_0 = arith.constant 0 : i32
    %c0_i32_1 = arith.constant 0 : i32
    return %arg0, %arg1, %c0_i32, %c0_i32_0 : i32, i32, i32, i32
  }
  func.func @transform_3(%arg0: i32, %arg1: i32) -> (i32, i32, i32, i32) {
    %c0_i32 = arith.constant 0 : i32
    %c0_i32_0 = arith.constant 0 : i32
    %c0_i32_1 = arith.constant 0 : i32
    return %arg0, %arg1, %c0_i32, %c0_i32_0 : i32, i32, i32, i32
  }
  func.func @transform_4(%arg0: i32, %arg1: i32) -> (i32, i32, i32, i32) {
    %c0_i32 = arith.constant 0 : i32
    %c0_i32_0 = arith.constant 0 : i32
    %c0_i32_1 = arith.constant 0 : i32
    return %arg0, %arg1, %c0_i32, %c0_i32_0 : i32, i32, i32, i32
  }
  func.func @transform_5(%arg0: i32, %arg1: i32) -> (i32, i32, i32, i32) {
    %c0_i32 = arith.constant 0 : i32
    %c0_i32_0 = arith.constant 0 : i32
    %c0_i32_1 = arith.constant 0 : i32
    return %arg0, %arg1, %c0_i32, %c0_i32_0 : i32, i32, i32, i32
  }
}

</mosaic_0001>

<bundles_post_ra>
// kernel: tpu_custom_call.1
= control target key start
LH: loop header
LB: loop body
LE: loop exit
PB: predicated region body
PF: predicated region fallthrough
CT: control target
= control target key end

     0   :  { %s1465_s0 = inlined_call_operand.hbm [shape: f32[2,4,256], index: 0, kind: input, shape index: {}]   ;;  %s1466_s1 = inlined_call_operand.hbm [shape: s32[2,1,256], index: 1, kind: input, shape index: {}]   ;;  %s1467_s2 = inlined_call_operand.hbm [shape: f32[2,1,4,128], index: 2, kind: output, shape index: {0}]   ;;  %s1468_s3 = inlined_call_operand.hbm [shape: f32[2,1,4,128], index: 3, kind: output, shape index: {1}]   ;;  %s1469_s4 = inlined_call_operand.hbm [shape: f32[2,1,4,128], index: 4, kind: output, shape index: {2}]   ;;  %s1470_s5 = inlined_call_operand.hbm [shape: f32[2,1,1,128], index: 5, kind: output, shape index: {3}]  }
   0x1   :  { %1479 = sst [smem:[#allocation22_spill]] %s1465_s0 }
   0x2   :  { %1480 = sst [smem:[#allocation23_spill]] %s1466_s1 }
   0x3   :  { %11 = vsyncpa [#allocation3], 0 }
   0x4   :  { %13 = vsyncpa [#allocation3 + $0x1], 0 }
   0x5   :  { %14 = vsyncpa [#allocation6], 0 }
   0x6   :  { %16 = vsyncpa [#allocation6 + $0x1], 0 }
   0x7   :  { %17 = vsyncpa [#allocation4], 0 }
   0x8   :  { %19 = vsyncpa [#allocation4 + $0x1], 0 }
   0x9   :  { %20 = vsyncpa [#allocation9], 0 }
   0xa   :  { %22 = vsyncpa [#allocation9 + $0x1], 0 }
   0xb   :  { %23 = vsyncpa [#allocation12], 0 }
   0xc   :  { %25 = vsyncpa [#allocation12 + $0x1], 0  ;;  %s1124_s18 = smov 0   ;;  %s1126_s19 = smov 0  }
   0xd   :  { %s1128_s20 = smov 0   ;;  %s1130_s21 = smov 0  }
   0xe   :  { %s1132_s22 = smov 0   ;;  %s1134_s23 = smov 0  }
   0xf LB: > { %1481 = sst [smem:[#allocation18_spill]] %s1073_s20  ;;  %s1155_s24 = sadd.s32 4294967295, %s1085_s23   ;;  %s1085_s23 = sphi %s1134_s23, %s31_s23   ;;  %s1081_s22 = sphi %s1132_s22, %s1507_s22   ;;  %s1077_s21 = sphi %s1130_s21, %s1506_s21   ;;  %s1073_s20 = sphi %s1128_s20, %s1505_s20   ;;  %s1069_s19 = sphi %s1126_s19, %s1509_s19   ;;  %s1065_s18 = sphi %s1124_s18, %s1508_s18  }
  0x10   : > { %1482 = sst [smem:[#allocation19_spill]] %s1081_s22  ;;  %s1472_s25 = sadd.s32 4294967294, %s1085_s23  }
  0x11   : > { %s43_s26 = sadd.s32 1, %s1081_s22  ;;  %s52_s27 = sadd.s32 1, %s1073_s20 }
  0x12   : > { %p45_p0 = scmp.ge.s32.totalorder %s43_s26, 2  ;;  %p59_p1 = scmp.ne.s32.totalorder %s1073_s20, %s1069_s19 }
  0x13   : > { %p60_p2 = scmp.eq.s32.totalorder %s1085_s23, 0  ;;  %p65_p3 = scmp.ne.s32.totalorder %s1069_s19, %s1065_s18 }
  0x14   : > { %s1511_s26 = smov (%p45_p0, %s43_s26), 0  ;;  %p66_p5 = scmp.eq.s32.totalorder %s1155_s24, 0 }
  0x15   : > { %1483 = sst [smem:[#allocation20_spill]] %s1511_s26  ;;  %p1167_p4 = por %p60_p2, %p59_p1 }
  0x16   : > { %s47_s29 = ssub.s32 %s1081_s22, %s1511_s26  ;;  %p119_p6 = scmp.eq.s32.totalorder %s1155_s24, 1 }
  0x17   : > { %p50_p7 = scmp.eq.s32.totalorder %s47_s29, 0  ;;  %p1175_p8 = por %p66_p5, %p65_p3 }
  0x18   : > { %p1179_p9 = por %p119_p6, %p59_p1  ;;  %p125_p10 = scmp.eq.s32.totalorder %s1472_s25, 1 }
  0x19   : > { %s1485_s30 = scalar_select %p1175_p8, 1, 0 }
  0x1a   : > { %s1486_s6 = scalar_select %p1179_p9, 1, 0 }
  0x1b   : > { %s1186_s7 = scalar_select %p50_p7, %s1073_s20, %s52_s27  }
  0x1c   : > { %p1188_p11 = por %p125_p10, %p65_p3  ;;  %p785_p13 = scmp.lt.s32.totalorder %s1085_s23, 2 }
  0x1d   : > { %1487 = sst [smem:[#allocation21_spill]] %s1186_s7  ;;  %s1195_s9 = sand.u32 1, %s1073_s20  }
  0x1e   : > { %s1488_s8 = scalar_select %p1188_p11, 1, 0 }
  0x1f   : > { %s728_s10 = sshll.u32 %s1195_s9, 3  ;;  %s751_s11 = sshll.u32 %s1081_s22, 7 }
  0x20   : > { %s1489_s0 = sld [smem:[#allocation22_spill]]  ;;  %s233_s15 = scalar_lea.vmem [#allocation2], %s728_s10 }
  0x21   : > { %s243_s16 = sshll.u32 %s233_s15, 4  ;;  %p1208_p0 = pnand %p785_p13, %p1167_p4  ;;  %s1204_s16 = int_to_ptr.vmem [resolvable:$true] %s243_s16 }
  0x22   : > { %s230_s27 = scalar_lea.sflag [#allocation3], %s1195_s9 }
  0x23   : > { %p849_p5 = pneg %p1208_p0 }
  0x26   : > { %s1202_s14 = scalar_lea.hbm %s1489_s0, %s751_s11  ;;  %s852_s28 = scalar_lea.hbm %s1489_s0, 256 }
  0x27   : > { %s847_s29 = scalar_lea.hbm %s1202_s14, 128  ;;  %p853_p4 = scmp.lt.u32.totalorder %s1202_s14, %s1489_s0 }
  0x28   : > { %p848_p3 = scmp.ne.s32.totalorder %s1202_s14, %s847_s29  ;;  %p854_p10 = scmp.lt.u32.totalorder %s852_s28, %s847_s29 }
  0x29   : > { %p856_p12 = scmp.lt.u32.totalorder %s847_s29, %s1202_s14 }
  0x2a   : > { %p850_p6 = pnand %p849_p5, %p848_p3  ;;  %p855_p13 = por %p854_p10, %p853_p4 }
  0x2c   : > { %p851_p7 = pneg %p850_p6  ;;  %p857_p1 = por %p856_p12, %p855_p13 }
  0x2e   : > { %p858_p2 = pnand %p857_p1, %p851_p7 }
  0x30   : > { %861 = shalt.err (!%p858_p2)
}
  0x31   : > { %s862_s15 = scalar_lea.vmem %s1204_s16, 128  ;;  %s1087_s10 = smov [#allocation2]  }
  0x32   : > { %p863_p3 = scmp.ne.s32.totalorder %s1204_s16, %s862_s15  ;;  %s867_s11 = sshll.u32 %s1087_s10, 4  ;;  %s868_s11 = int_to_ptr.vmem [resolvable:$false] %s867_s11 }
  0x33   : > { %s869_s12 = scalar_lea.vmem %s868_s11, 256  ;;  %p870_p9 = scmp.lt.s32.totalorder %s1204_s16, %s868_s11 }
  0x34   : > { %p865_p6 = pnand %p863_p3, %p849_p5  ;;  %p871_p4 = scmp.lt.s32.totalorder %s869_s12, %s862_s15 }
  0x36   : > { %p866_p11 = pneg %p865_p6  ;;  %p872_p10 = por %p871_p4, %p870_p9 }
  0x38   : > { %p873_p12 = pnand %p872_p10, %p866_p11 }
  0x3a   : > { %876 = shalt.err (!%p873_p12)
}
  0x3b   : > { %768 = dma.hbm_to_vmem [thread:$0]  (!%p1208_p0), %s1202_s14, 128, %s1204_s16, %s230_s27  }
  0x3c   : > { %p1491_p1 = scmp.lt.s32.totalorder %s1085_s23, 3  ;;  %p1492_p2 = scmp.ge.s32.totalorder %s1085_s23, 1 }
  0x3d   : > { %s731_s28 = sshll.u32 %s1195_s9, 1  ;;  %s752_s13 = sshll.u32 %s1081_s22, 5 }
  0x3e   : > { %p1244_p7 = pnand %p1492_p2, %p1491_p1  ;;  %s1494_s1 = sld [smem:[#allocation23_spill]] }
  0x3f   : > { %s254_s12 = scalar_lea.vmem [#allocation5], %s731_s28  ;;  %s251_s14 = scalar_lea.sflag [#allocation6], %s1195_s9 }
  0x40   : > { %s1493_s29 = scalar_select %p1244_p7, 1, 0 }
  0x41   : > { %s264_s25 = sshll.u32 %s254_s12, 4  ;;  %s265_s25 = int_to_ptr.vmem [resolvable:$true] %s264_s25 }
  0x44   : > { %s1253_s11 = scalar_lea.hbm %s1494_s1, %s752_s13  ;;  %s882_s15 = scalar_lea.hbm %s1494_s1, 64 }
  0x45   : > { %s877_s16 = scalar_lea.hbm %s1253_s11, 32  ;;  %p883_p3 = scmp.lt.u32.totalorder %s1253_s11, %s1494_s1 }
  0x46   : > { %p878_p9 = scmp.ne.s32.totalorder %s1253_s11, %s877_s16  ;;  %p884_p6 = scmp.lt.u32.totalorder %s882_s15, %s877_s16 }
  0x47   : > { %p886_p10 = scmp.lt.u32.totalorder %s877_s16, %s1253_s11 }
  0x48   : > { %p880_p11 = pnand %p878_p9, %p849_p5  ;;  %p885_p4 = por %p884_p6, %p883_p3 }
  0x4a   : > { %p881_p13 = pneg %p880_p11  ;;  %p887_p12 = por %p886_p10, %p885_p4 }
  0x4c   : > { %p888_p1 = pnand %p887_p12, %p881_p13 }
  0x4e   : > { %891 = shalt.err (!%p888_p1)
}
  0x4f   : > { %s892_s9 = scalar_lea.vmem %s265_s25, 32  ;;  %s1088_s28 = smov [#allocation5]  }
  0x50   : > { %p893_p2 = scmp.ne.s32.totalorder %s265_s25, %s892_s9  ;;  %s897_s0 = sshll.u32 %s1088_s28, 4  ;;  %s898_s0 = int_to_ptr.vmem [resolvable:$false] %s897_s0 }
  0x51   : > { %s899_s12 = scalar_lea.vmem %s898_s0, 64  ;;  %p900_p8 = scmp.lt.s32.totalorder %s265_s25, %s898_s0 }
  0x52   : > { %p895_p9 = pnand %p893_p2, %p849_p5  ;;  %p901_p7 = scmp.lt.s32.totalorder %s899_s12, %s892_s9 }
  0x54   : > { %p896_p11 = pneg %p895_p9  ;;  %p902_p3 = por %p901_p7, %p900_p8 }
  0x56   : > { %p903_p6 = pnand %p902_p3, %p896_p11 }
  0x58   : > { %906 = shalt.err (!%p903_p6)
}
  0x59   : > { %771 = dma.hbm_to_vmem [thread:$0]  (!%p1208_p0), %s1253_s11, 32, %s265_s25, %s251_s14  }
  0x5a   : > { %p1495_p13 = scmp.ne.s32.totalorder %s1493_s29, 0 }
  0x5b   : > { %s1278_s16 = sand.u32 (!%p1495_p13), 1, %s1069_s19   ;;  %p1496_p5 = scmp.ne.s32.totalorder (!%p1495_p13), %s1485_s30, 0 }
  0x5c   : > { %273 = sbr.rel (%p1495_p13) target bundleno = 262 (0x106), region = 28  ;;  %s735_s27 = sshll.u32 (!%p1495_p13), %s1278_s16, 3 }
  0x5d   : > { %s276_s15 = scalar_lea.sflag (!%p1495_p13), [#allocation3], %s1278_s16  ;;  %s279_s13 = scalar_lea.vmem (!%p1495_p13), [#allocation2], %s735_s27 }
  0x63   : > { %1044 = dma.done.wait (%p1496_p5), %s276_s15, 128  }
  0x64   : > { %1046 = vsyncadd (%p1496_p5), %s276_s15, 4294967168  ;;  %s736_s25 = sshll.u32 %s1278_s16, 1  ;;  %s285_s17 = scalar_lea.sflag [#allocation6], %s1278_s16 }
  0x65   : > { %s288_s29 = scalar_lea.vmem [#allocation5], %s736_s25 }
  0x66   : > { %1048 = dma.done.wait (%p1496_p5), %s285_s17, 32  }
  0x67   : > { %1050 = vsyncadd (%p1496_p5), %s285_s17, 4294967264  ;;  %v336_v0 = vlaneseq  ;;  %vm357_vm0 = vcmask 1043456   ;;  %v338_v4 = vld [vmem:[%s279_s13] sm:$0xff]  ;;  %v339_v5 = vld [vmem:[%s288_s29] sm:$0x3]  ;;  %s1293_s11 = sshll.u32 %s1278_s16, 2 }
  0x68   : > { %v355_v6 = vcombine.high %v338_v4, %v338_v4  ;;  %v358_v7 = vsel %vm357_vm0, %v338_v4, -inf  ;;  %v1089_v14 = vmov 0.0   ;;  %s327_s30 = scalar_lea.vmem [#allocation10], %s1293_s11  ;;  %s1475_s14 = scalar_lea.vmem [#allocation8], %s1293_s11 }
  0x69   : > { %v337_v1 = vshrl.u32 %v336_v0, 7  ;;  %v359_v10 = vrot.slane %v358_v7, 4  ;;  %s496_s10 = sshll.u32 %s1475_s14, 4  ;;  %s1474_s9 = scalar_lea.vmem [#allocation7], %s1293_s11  ;;  %s1310_s10 = int_to_ptr.vmem [resolvable:$true] %s496_s10 }
  0x6a   : > { %v365_v11 = vsel %vm357_vm0, %v355_v6, -inf  ;;  %s482_s28 = sshll.u32 %s1474_s9, 4  ;;  %s333_s0 = scalar_lea.vmem [#allocation11], %s1278_s16  ;;  %s1316_s28 = int_to_ptr.vmem [resolvable:$true] %s482_s28 }
  0x6b   : > { %v342_v2 = vsub.s32 0, %v337_v1  ;;  %v346_v3 = vsub.s32 1, %v337_v1  ;;  %v360_v12 = vmax.f32 %v358_v7, %v359_v10  ;;  %v366_v13 = vrot.slane %v365_v11, 4  ;;  %s524_s12 = sshll.u32 %s333_s0, 4  ;;  %s510_s27 = sshll.u32 %s327_s30, 4  ;;  %s1319_s12 = int_to_ptr.vmem [resolvable:$true] %s524_s12  ;;  %s1322_s27 = int_to_ptr.vmem [resolvable:$true] %s510_s27 }
  0x6c   : > { %s748_s13 = sshll.u32 %s1077_s21, 4  ;;  %s745_s25 = sshll.u32 %s1077_s21, 6 }
  0x6d   : > { %v343_v8 = vrot.slane %v339_v5, %v342_v2  ;;  %v347_v9 = vrot.slane %v339_v5, %v346_v3  ;;  %v361_v18 = vrot.slane %v360_v12, 2  ;;  %v367_v19 = vmax.f32 %v365_v11, %v366_v13  ;;  %s1332_s14 = scalar_lea.hbm %s1468_s3, %s745_s25  ;;  %s1337_s26 = scalar_lea.hbm %s1467_s2, %s745_s25 }
  0x6e   : > { %s1342_s17 = scalar_lea.hbm %s1469_s4, %s745_s25  ;;  %s1498_s29 = scalar_lea.vmem [#allocation7], %s1293_s11 }
  0x6f   : > { %vm348_vm1 = vcmp.eq.s32.totalorder %v337_v1, %v343_v8  ;;  %vm349_vm2 = vcmp.eq.s32.totalorder %v337_v1, %v347_v9  ;;  %v362_v20 = vmax.f32 %v360_v12, %v361_v18  ;;  %v368_v21 = vrot.slane %v367_v19, 2  ;;  %s469_s20 = scalar_lea.sflag [#allocation12], %s1278_s16  ;;  %s907_s9 = scalar_lea.vmem %s1319_s12, 16 }
  0x70   : > { %v740_v15 = vsel %vm348_vm1, 1.0, %v1089_v14  ;;  %v741_v16 = vsel %vm349_vm2, 1.0, %v1089_v14  ;;  %p908_p8 = scmp.ne.s32.totalorder %s1319_s12, %s907_s9  ;;  %p1499_p0 = scmp.ne.s32.totalorder %s1486_s6, 0 }
  0x71   : > { %v443_v17 = vadd.f32 %v741_v16, %v740_v15  ;;  %v363_v22 = vrot.slane %v362_v20, 1  ;;  %v369_v23 = vmax.f32 %v367_v19, %v368_v21  ;;  %v411_v30 = vcombine.low %v740_v15, %v741_v16 }
  0x72   : > { %p909_p7 = pnand %p908_p8, %p1499_p0 }
  0x73   : > { %451 = vst [vmem:[%s327_s30] sm:$0xf] %v443_v17  ;;  %v364_v24 = vmax.f32 %v362_v20, %v363_v22  ;;  %v370_v25 = vrot.slane %v369_v23, 1  ;;  %v413_v31 = vmul.f32 %v411_v30, %v338_v4  ;;  %s1327_s30 = scalar_lea.hbm %s1470_s5, %s748_s13  ;;  %s1497_s13 = scalar_lea.vmem [#allocation8], %s1293_s11 }
  0x74   : > { %p910_p4 = pneg %p909_p7 }
  0x75   : > { %v371_v26 = vmax.f32 %v369_v23, %v370_v25  ;;  %v415_v35 = vcombine.high %v413_v31, %v413_v31  ;;  %v417_v38 = vsel %vm357_vm0, %v413_v31, 0.0 }
  0x76   : > { %v418_v44 = vrot.slane %v417_v38, 4 }
  0x77   : > { %v374_v27 = vcombine.low %v364_v24, %v371_v26  ;;  %v424_v41 = vsel %vm357_vm0, %v415_v35, 0.0 }
  0x78   : > { %v425_v47 = vrot.slane %v424_v41, 4  ;;  %v419_v50 = vadd.f32 %v418_v44, %v417_v38 }
  0x79   : > { %v376_v28 = vsub.f32 %v338_v4, %v374_v27 }
  0x7a   : > { %v426_v53 = vadd.f32 %v425_v47, %v424_v41  ;;  %v420_v55 = vrot.slane %v419_v50, 2 }
  0x7b   : > { %v377_v29 = vmul.f32 1.442695, %v376_v28 }
  0x7c   : > { %v427_v56 = vrot.slane %v426_v53, 2  ;;  %v421_v57 = vadd.f32 %v420_v55, %v419_v50 }
  0x7d   : > { %837 = vpow2.f32 %v377_v29 }
  0x7e   : > { %v428_v58 = vadd.f32 %v427_v56, %v426_v53  ;;  %v422_v59 = vrot.slane %v421_v57, 1 }
  0x80   : > { %v429_v61 = vrot.slane %v428_v58, 1  ;;  %v423_v1 = vadd.f32 %v422_v59, %v421_v57 }
  0x82   : > { %v430_v6 = vadd.f32 %v429_v61, %v428_v58 }
  0x87   : > { %v838_v32 = vpop.eup %837 }
  0x88   : > { %v380_v33 = vcombine.high %v838_v32, %v838_v32  ;;  %v382_v34 = vsel %vm357_vm0, %v838_v32, 0.0 }
  0x89   : > { %v383_v36 = vrot.slane %v382_v34, 4 }
  0x8a   : > { %v389_v37 = vsel %vm357_vm0, %v380_v33, 0.0 }
  0x8b   : > { %v384_v39 = vadd.f32 %v383_v36, %v382_v34  ;;  %v390_v40 = vrot.slane %v389_v37, 4 }
  0x8d   : > { %v385_v42 = vrot.slane %v384_v39, 2  ;;  %v391_v43 = vadd.f32 %v390_v40, %v389_v37 }
  0x8f   : > { %v386_v45 = vadd.f32 %v385_v42, %v384_v39  ;;  %v392_v46 = vrot.slane %v391_v43, 2 }
  0x91   : > { %v387_v48 = vrot.slane %v386_v45, 1  ;;  %v393_v49 = vadd.f32 %v392_v46, %v391_v43 }
  0x93   : > { %v388_v51 = vadd.f32 %v387_v48, %v386_v45  ;;  %v394_v52 = vrot.slane %v393_v49, 1 }
  0x95   : > { %v395_v54 = vadd.f32 %v394_v52, %v393_v49  ;;  %839 = vrcp.f32 %v388_v51 }
  0x96   : > { %841 = vlog2.f32 %v388_v51 }
  0x97   : > { %843 = vrcp.f32 %v395_v54 }
  0x98   : > { %845 = vlog2.f32 %v395_v54 }
  0x9f   : > { %v840_v60 = vpop.eup %839 }
  0xa0   : > { %v842_v62 = vpop.eup %841 }
  0xa1   : > { %v844_v63 = vpop.eup %843  ;;  %v404_v0 = vmul.f32 0.6931472, %v842_v62 }
  0xa2   : > { %v846_v2 = vpop.eup %845  ;;  %v400_v3 = vcombine.low %v840_v60, %v844_v63 }
  0xa3   : > { %v406_v4 = vmul.f32 0.6931472, %v846_v2  ;;  %v407_v5 = vadd.f32 %v404_v0, %v364_v24 }
  0xa4   : > { %v402_v7 = vmul.f32 %v838_v32, %v400_v3 }
  0xa5   : > { %v408_v8 = vadd.f32 %v406_v4, %v371_v26  ;;  %v431_v9 = vsub.f32 %v407_v5, %v423_v1 }
  0xa6   : > { %v433_v10 = vmul.f32 %v402_v7, %v402_v7  ;;  %v434_v11 = vmul.f32 %v411_v30, %v402_v7 }
  0xa7   : > { %v432_v12 = vsub.f32 %v408_v8, %v430_v6 }
  0xa8   : > { %v440_v13 = vrot.slane %v433_v10, 4  ;;  %v436_v14 = vrot.slane %v434_v11, 4 }
  0xa9   : > { %v444_v15 = vadd.f32 %v432_v12, %v431_v9 }
  0xaa   : > { %v442_v16 = vadd.f32 %v440_v13, %v433_v10  ;;  %v438_v17 = vadd.f32 %v436_v14, %v434_v11 }
  0xab   : > { %452 = vst [vmem:[%s333_s0] sm:$0x1] %v444_v15  ;;  %s1090_s0 = smov [#allocation11]  }
  0xac   : > { %450 = vst [vmem:[%s1497_s13] sm:$0xf] %v442_v16  ;;  %449 = vst [vmem:[%s1498_s29] sm:$0xf] %v438_v17  ;;  %s911_s15 = sshll.u32 %s1090_s0, 4  ;;  %s912_s15 = int_to_ptr.vmem [resolvable:$false] %s911_s15 }
  0xad   : > { %s913_s1 = scalar_lea.vmem %s912_s15, 32  ;;  %p914_p10 = scmp.lt.s32.totalorder %s1319_s12, %s912_s15 }
  0xae   : > { %p915_p12 = scmp.lt.s32.totalorder %s913_s1, %s907_s9 }
  0xb0   : > { %p916_p1 = por %p915_p12, %p914_p10 }
  0xb2   : > { %p917_p2 = pnand %p916_p1, %p910_p4 }
  0xb4   : > { %920 = shalt.err (!%p917_p2)
}
  0xb5   : > { %s921_s22 = scalar_lea.hbm %s1327_s30, 16  ;;  %s925_s25 = scalar_lea.hbm %s1470_s5, 32 }
  0xb6   : > { %p922_p9 = scmp.ne.s32.totalorder %s1327_s30, %s921_s22  ;;  %p926_p6 = scmp.lt.u32.totalorder %s1327_s30, %s1470_s5 }
  0xb7   : > { %p927_p13 = scmp.lt.u32.totalorder %s925_s25, %s921_s22  ;;  %p929_p8 = scmp.lt.u32.totalorder %s921_s22, %s1327_s30 }
  0xb8   : > { %p923_p11 = pnand %p922_p9, %p1499_p0 }
  0xb9   : > { %p928_p5 = por %p927_p13, %p926_p6 }
  0xba   : > { %p924_p3 = pneg %p923_p11 }
  0xbb   : > { %p930_p7 = por %p929_p8, %p928_p5 }
  0xbd   : > { %p931_p4 = pnand %p930_p7, %p924_p3 }
  0xbf   : > { %934 = shalt.err (!%p931_p4)
}
  0xc0   : > { %760 = dma.vmem_to_hbm [thread:$0]  (%p1499_p0), %s1319_s12, 16, %s1327_s30, %s469_s20  }
  0xc1   : > { %s1500_s29 = sand.u32 1, %s1155_s24   ;;  %s935_s0 = scalar_lea.vmem %s1310_s10, 64 }
  0xc2   : > { %s1372_s9 = scalar_lea.sflag [#allocation9], %s1500_s29  ;;  %p936_p10 = scmp.ne.s32.totalorder %s1310_s10, %s935_s0 }
  0xc3   : > { %s1091_s15 = smov [#allocation8]  }
  0xc4   : > { %p937_p12 = pnand %p936_p10, %p1499_p0  ;;  %s939_s1 = sshll.u32 %s1091_s15, 4  ;;  %s940_s1 = int_to_ptr.vmem [resolvable:$false] %s939_s1 }
  0xc5   : > { %s941_s22 = scalar_lea.vmem %s940_s1, 128  ;;  %p942_p2 = scmp.lt.s32.totalorder %s1310_s10, %s940_s1 }
  0xc6   : > { %p938_p1 = pneg %p937_p12  ;;  %p943_p9 = scmp.lt.s32.totalorder %s941_s22, %s935_s0 }
  0xc8   : > { %p944_p11 = por %p943_p9, %p942_p2 }
  0xca   : > { %p945_p3 = pnand %p944_p11, %p938_p1 }
  0xcc   : > { %948 = shalt.err (!%p945_p3)
}
  0xcd   : > { %s949_s20 = scalar_lea.hbm %s1332_s14, 64  ;;  %s953_s30 = scalar_lea.hbm %s1468_s3, 128 }
  0xce   : > { %p950_p6 = scmp.ne.s32.totalorder %s1332_s14, %s949_s20  ;;  %p954_p8 = scmp.lt.u32.totalorder %s1332_s14, %s1468_s3 }
  0xcf   : > { %p955_p7 = scmp.lt.u32.totalorder %s953_s30, %s949_s20  ;;  %p957_p10 = scmp.lt.u32.totalorder %s949_s20, %s1332_s14 }
  0xd0   : > { %p951_p13 = pnand %p950_p6, %p1499_p0 }
  0xd1   : > { %p956_p4 = por %p955_p7, %p954_p8 }
  0xd2   : > { %p952_p5 = pneg %p951_p13 }
  0xd3   : > { %p958_p12 = por %p957_p10, %p956_p4 }
  0xd5   : > { %p959_p1 = pnand %p958_p12, %p952_p5 }
  0xd7   : > { %962 = shalt.err (!%p959_p1)
}
  0xd8   : > { %758 = dma.vmem_to_hbm [thread:$0]  (%p1499_p0), %s1310_s10, 64, %s1332_s14, %s1372_s9  }
  0xd9   : > { %s454_s25 = scalar_lea.sflag [#allocation4], %s1278_s16  ;;  %s963_s21 = scalar_lea.vmem %s1316_s28, 64 }
  0xda   : > { %p964_p2 = scmp.ne.s32.totalorder %s1316_s28, %s963_s21  ;;  %s1092_s13 = smov [#allocation7]  }
  0xdb   : > { %s967_s29 = sshll.u32 %s1092_s13, 4  ;;  %s968_s29 = int_to_ptr.vmem [resolvable:$false] %s967_s29 }
  0xdc   : > { %p965_p9 = pnand %p964_p2, %p1499_p0  ;;  %s969_s0 = scalar_lea.vmem %s968_s29, 128 }
  0xdd   : > { %p970_p3 = scmp.lt.s32.totalorder %s1316_s28, %s968_s29  ;;  %p971_p6 = scmp.lt.s32.totalorder %s969_s0, %s963_s21 }
  0xde   : > { %p966_p11 = pneg %p965_p9 }
  0xdf   : > { %p972_p13 = por %p971_p6, %p970_p3 }
  0xe1   : > { %p973_p5 = pnand %p972_p13, %p966_p11 }
  0xe3   : > { %976 = shalt.err (!%p973_p5)
}
  0xe4   : > { %s977_s16 = scalar_lea.hbm %s1337_s26, 64  ;;  %s981_s15 = scalar_lea.hbm %s1467_s2, 128 }
  0xe5   : > { %p978_p8 = scmp.ne.s32.totalorder %s1337_s26, %s977_s16  ;;  %p982_p10 = scmp.lt.u32.totalorder %s1337_s26, %s1467_s2 }
  0xe6   : > { %p983_p12 = scmp.lt.u32.totalorder %s981_s15, %s977_s16  ;;  %p985_p2 = scmp.lt.u32.totalorder %s977_s16, %s1337_s26 }
  0xe7   : > { %p979_p7 = pnand %p978_p8, %p1499_p0 }
  0xe8   : > { %p984_p1 = por %p983_p12, %p982_p10 }
  0xe9   : > { %p980_p4 = pneg %p979_p7 }
  0xea   : > { %p986_p9 = por %p985_p2, %p984_p1 }
  0xec   : > { %p987_p11 = pnand %p986_p9, %p980_p4 }
  0xee   : > { %990 = shalt.err (!%p987_p11)
}
  0xef   : > { %757 = dma.vmem_to_hbm [thread:$0]  (%p1499_p0), %s1316_s28, 64, %s1337_s26, %s454_s25  }
  0xf0   : > { %s991_s20 = scalar_lea.vmem %s1322_s27, 64  ;;  %s1093_s24 = smov [#allocation10]  }
  0xf1   : > { %p992_p3 = scmp.ne.s32.totalorder %s1322_s27, %s991_s20  ;;  %s995_s12 = sshll.u32 %s1093_s24, 4  ;;  %s996_s12 = int_to_ptr.vmem [resolvable:$false] %s995_s12 }
  0xf2   : > { %s997_s30 = scalar_lea.vmem %s996_s12, 128  ;;  %p998_p5 = scmp.lt.s32.totalorder %s1322_s27, %s996_s12 }
  0xf3   : > { %p993_p6 = pnand %p992_p3, %p1499_p0  ;;  %p999_p8 = scmp.lt.s32.totalorder %s997_s30, %s991_s20 }
  0xf5   : > { %p994_p13 = pneg %p993_p6  ;;  %p1000_p7 = por %p999_p8, %p998_p5 }
  0xf7   : > { %p1001_p4 = pnand %p1000_p7, %p994_p13 }
  0xf9   : > { %1004 = shalt.err (!%p1001_p4)
}
  0xfa   : > { %s1005_s26 = scalar_lea.hbm %s1342_s17, 64  ;;  %s1009_s11 = scalar_lea.hbm %s1469_s4, 128 }
  0xfb   : > { %p1006_p10 = scmp.ne.s32.totalorder %s1342_s17, %s1005_s26  ;;  %p1010_p2 = scmp.lt.u32.totalorder %s1342_s17, %s1469_s4 }
  0xfc   : > { %p1011_p9 = scmp.lt.u32.totalorder %s1009_s11, %s1005_s26  ;;  %p1013_p3 = scmp.lt.u32.totalorder %s1005_s26, %s1342_s17 }
  0xfd   : > { %p1007_p12 = pnand %p1006_p10, %p1499_p0 }
  0xfe   : > { %p1012_p11 = por %p1011_p9, %p1010_p2 }
  0xff   : > { %p1008_p1 = pneg %p1007_p12 }
 0x100   : > { %p1014_p6 = por %p1013_p3, %p1012_p11 }
 0x102   : > { %p1015_p13 = pnand %p1014_p6, %p1008_p1 }
 0x104   : > { %1018 = shalt.err (!%p1015_p13)
}
 0x105   : > { %759 = dma.vmem_to_hbm [thread:$0]  (%p1499_p0), %s1322_s27, 64, %s1342_s17, %s1372_s9  }
 0x106 PF: > { %s536_s13 = sand.u32 1, %s1065_s18   ;;  %p1501_p5 = scmp.ne.s32.totalorder %s1488_s8, 0 }
 0x107   : > { %p1502_p8 = scmp.ge.s32.totalorder %s1085_s23, 2  ;;  %s537_s29 = scalar_lea.sflag [#allocation4], %s536_s13 }
 0x109   : > { %p773_p7 = pnand %p1502_p8, %p1501_p5 }
 0x10b   : > { %1052 = dma.done.wait (!%p773_p7), %s537_s29, 64  }
 0x10c   : > { %1054 = vsyncadd (!%p773_p7), %s537_s29, 4294967232  ;;  %s1503_s0 = sadd.s32 4294967294, %s1085_s23  }
 0x10d   : > { %s545_s16 = sand.u32 1, %s1503_s0  }
 0x10e   : > { %s546_s14 = scalar_lea.sflag [#allocation9], %s545_s16 }
 0x10f   : > { %1056 = dma.done.wait (!%p773_p7), %s546_s14, 128  }
 0x110   : > { %1058 = vsyncadd (!%p773_p7), %s546_s14, 4294967168  ;;  %s564_s6 = scalar_lea.sflag [#allocation12], %s536_s13 }
 0x111   : > { %1060 = dma.done.wait (!%p773_p7), %s564_s6, 16  }
 0x112   : > { %1062 = vsyncadd (!%p773_p7), %s564_s6, 4294967280  ;;  %s31_s23 = sadd.s32 1, %s1085_s23   ;;  %s1504_s27 = sld [smem:[#allocation18_spill]] }
 0x113   : > { %p28_p0 = scmp.ge.s32.totalorder %s31_s23, 4   ;;  %s1505_s20 = sld [smem:[#allocation21_spill]] }
 0x114   : > { %s1506_s21 = sld [smem:[#allocation19_spill]]  ;;  %s1507_s22 = sld [smem:[#allocation20_spill]] }
 0x115   : > { %s1508_s18 = smov %s1069_s19  ;;  %30 = sbr.rel (!%p28_p0) target bundleno = 15 (0xf), region = 135 }
 0x118   : > { %s1509_s19 = smov %s1504_s27 }
 0x11c   :  { %568 = vsyncpa [#allocation3], 1 }
 0x11d   :  { %570 = vsyncpa [#allocation3 + $0x1], 1 }
 0x11e   :  { %571 = vsyncpa [#allocation6], 1 }
 0x11f   :  { %573 = vsyncpa [#allocation6 + $0x1], 1 }
 0x120   :  { %574 = vsyncpa [#allocation4], 1 }
 0x121   :  { %576 = vsyncpa [#allocation4 + $0x1], 1 }
 0x122   :  { %577 = vsyncpa [#allocation9], 1 }
 0x123   :  { %579 = vsyncpa [#allocation9 + $0x1], 1 }
 0x124   :  { %580 = vsyncpa [#allocation12], 1 }
 0x125   :  { %582 = vsyncpa [#allocation12 + $0x1], 1 }

</bundles_post_ra>
